<compile_context>
chip_gen: v7x
topology: tpu7x:2x2x1
jax: 0.10.0
libtpu: 0.0.40
codegen_flags: <defaults>
</compile_context>

<pallas_src>
import functools

import jax
import jax.numpy as jnp
from jax.experimental import pallas as pl
from jax.experimental.pallas import tpu as pltpu


def _round_up(x, m):
    return ((x + m - 1) // m) * m


def _cdiv(a, b):
    return -(-a // b)


def mlp_kernel(x_ref, w1_ref, b1_ref, w2_ref, w3_ref, o_ref):
    """3-layer MLP on one (tb, D) batch tile. Weights are grid-invariant (resident)."""
    wdt = w1_ref.dtype
    x = x_ref[...]
    # linear1 (+bias) -> ReLU   (Dropout1 = identity in eval). MXU in weight dtype, f32 acc.
    h = jnp.dot(x.astype(wdt), w1_ref[...], preferred_element_type=jnp.float32)
    h = jnp.maximum(h + b1_ref[...], 0.0)            # bias add + ReLU stay f32 (VPU)
    # linear2 (no bias) -> ReLU (Dropout2 = identity in eval)
    h = jnp.dot(h.astype(wdt), w2_ref[...], preferred_element_type=jnp.float32)
    h = jnp.maximum(h, 0.0)
    # linear3 (no bias)
    o_ref[...] = jnp.dot(h.astype(wdt), w3_ref[...],
                         preferred_element_type=jnp.float32).astype(o_ref.dtype)


def prepare_encoding_model_params(w1, b1, w2, w3, *, weight_dtype=jnp.float32):
    """One-time (model-load) weight prep.  Do NOT call per forward step.

    w1, w2: (D, D) PyTorch nn.Linear weights, stored (out, in)
    b1:     (D,) or (1, D) linear1 bias
    w3:     (C, D) linear3 weight, stored (out, in)
    Returns (in, out)-layout device arrays in `weight_dtype` (bias stays f32).
    Use weight_dtype=jnp.bfloat16 for the fast MXU path on v6e/v7x.
    """
    return {
        "w1_t": jnp.asarray(w1, weight_dtype).T,
        "b1": jnp.asarray(b1, jnp.float32).reshape(1, -1),
        "w2_t": jnp.asarray(w2, weight_dtype).T,
        "w3_t": jnp.asarray(w3, weight_dtype).T,
    }


def encoding_model_forward(x, params, *, block_b=512):
    """Eval-mode forward of Encoding_model (mlp variant).

    x:      (B, D) float32
    params: output of prepare_encoding_model_params()
    block_b: target batch rows per grid step (rounded to the 8-row sublane tile)
    """
    w1_t, b1, w2_t, w3_t = params["w1_t"], params["b1"], params["w2_t"], params["w3_t"]
    B, D = x.shape
    C = w3_t.shape[1]
    wdt = w1_t.dtype
    wbytes = jnp.dtype(wdt).itemsize

    # ---- batch tiling --------------------------------------------------------
    block_b = max(8, int(block_b))
    # >= 2 grid steps whenever B > 8 so both v7x TensorCores get work.
    nb = max(_cdiv(B, block_b), 2 if B > 8 else 1)
    if nb == 1:
        tb, Bp = B, B                          # single full-extent block, no padding
    else:
        tb = _round_up(_cdiv(B, nb), 8)
        Bp = _round_up(B, tb)

    # ---- VMEM accounting -----------------------------------------------------
    # BlockSpec double-buffers every operand (including the grid-invariant weight
    # blocks), and the kernel keeps an f32 h plus cast copies live.  Account in
    # VMEM-layout units: sublanes round to 8, lanes to 128.
    def vmem_bytes(tb_):
        Dl, Cl = _round_up(D, 128), _round_up(C, 128)
        Dr, tr = _round_up(D, 8), _round_up(tb_, 8)
        w = 2 * ((2 * Dr * Dl + Dr * Cl) * wbytes + 8 * Dl * 4)   # w1,w2,w3,b1 x2 buffers
        s = 2 * (tr * Dl + tr * Cl) * 4                           # x in + out, x2 buffers
        i = tr * (3 * Dl + Cl) * 4                                # intermediates headroom
        return w + s + i

    while vmem_bytes(tb) > (56 << 20) and tb > 8:   # stay inside v7x's 64 MiB physical
        tb = max(8, _round_up(tb // 2, 8))
        Bp = _round_up(B, tb)
    nb = _cdiv(Bp, tb)
    # Raise the scoped limit above v5e's 16 MiB default; cap below v7x physical.
    vmem_limit = min(max(int(vmem_bytes(tb) * 1.25) + (2 << 20), 32 << 20), 60 << 20)

    # Only the batch remainder gets padded (no feature-dim copies).
    xp = x if Bp == B else jnp.pad(x, ((0, Bp - B), (0, 0)))

    cost = pl.CostEstimate(
        flops=2 * Bp * (2 * D * D + D * C),
        transcendentals=0,
        bytes_accessed=(Bp * D + Bp * C) * 4 + (2 * D * D + D * C) * wbytes + D * 4,
    )

    out = pl.pallas_call(
        mlp_kernel,
        out_shape=jax.ShapeDtypeStruct((Bp, C), jnp.float32),
        grid=(nb,),
        in_specs=[
            pl.BlockSpec((tb, D), lambda i: (i, 0)),    # x tile, streamed over batch
            pl.BlockSpec((D, D), lambda i: (0, 0)),     # w1 (grid-invariant / resident)
            pl.BlockSpec((1, D), lambda i: (0, 0)),     # b1 (resident)
            pl.BlockSpec((D, D), lambda i: (0, 0)),     # w2 (resident)
            pl.BlockSpec((D, C), lambda i: (0, 0)),     # w3 (resident)
        ],
        out_specs=pl.BlockSpec((tb, C), lambda i: (i, 0)),
        compiler_params=pltpu.CompilerParams(
            dimension_semantics=("parallel",),
            vmem_limit_bytes=vmem_limit,
        ),
        cost_estimate=cost,
    )(xp, w1_t, b1, w2_t, w3_t)

    return out if Bp == B else out[:B]


if __name__ == "__main__":
    # Small shapes consistent with the module.
    B = 8                    # batch
    D = 32                   # brain_embed_size (= num_input)
    C = 16                   # word_embed_size  (= num_classes)

    key = jax.random.PRNGKey(0)
    kx, kw1, kb1, kw2, kw3 = jax.random.split(key, 5)

    x = jax.random.normal(kx, (B, D), dtype=jnp.float32)

    # init_weights: nn.init.normal_(weight, std=0.01); PyTorch stores (out, in).
    w1 = 0.01 * jax.random.normal(kw1, (D, D), dtype=jnp.float32)   # linear1 weight (out, in)
    bound = 1.0 / jnp.sqrt(jnp.float32(D))                          # PyTorch default bias init
    b1 = jax.random.uniform(kb1, (D,), minval=-bound, maxval=bound, dtype=jnp.float32)
    w2 = 0.01 * jax.random.normal(kw2, (D, D), dtype=jnp.float32)   # linear2 weight (out, in)
    w3 = 0.01 * jax.random.normal(kw3, (C, D), dtype=jnp.float32)   # linear3 weight (out, in)

    def ref_fn(xx):
        h = jnp.maximum(xx @ w1.T + b1[None, :], 0.0)
        h = jnp.maximum(h @ w2.T, 0.0)
        return h @ w3.T

    # --- f32 path (matches PyTorch f32 eval semantics) ---
    params = prepare_encoding_model_params(w1, b1, w2, w3)          # once, at model load
    fwd = jax.jit(functools.partial(encoding_model_forward, block_b=512))
    out = jax.block_until_ready(fwd(x, params))
    ref = ref_fn(x)
    assert out.shape == (B, C)
    assert jnp.allclose(out, ref, atol=1e-5, rtol=1e-5)

    # --- multi-step grid + batch-remainder padding + bf16 MXU path (v6e/v7x) ---
    params_bf16 = prepare_encoding_model_params(w1, b1, w2, w3,
                                                weight_dtype=jnp.bfloat16)
    B2 = 20
    x2 = jax.random.normal(jax.random.PRNGKey(1), (B2, D), dtype=jnp.float32)
    out2 = jax.block_until_ready(
        encoding_model_forward(x2, params_bf16, block_b=8))
    ref2 = ref_fn(x2)
    assert out2.shape == (B2, C)
    assert jnp.allclose(out2, ref2, atol=2e-3, rtol=2e-2)

    print("KERNEL_OK")
</pallas_src>

<mosaic_0001>
module attributes {stable_mosaic.version = 11 : i64} {
  func.func @mlp_kernel(%arg0: i32, %arg1: memref<8x32xf32, #tpu.memory_space<vmem>>, %arg2: memref<32x32xf32, #tpu.memory_space<vmem>>, %arg3: memref<1x32xf32, #tpu.memory_space<vmem>>, %arg4: memref<32x32xf32, #tpu.memory_space<vmem>>, %arg5: memref<32x16xf32, #tpu.memory_space<vmem>>, %arg6: memref<8x16xf32, #tpu.memory_space<vmem>>) attributes {dimension_semantics = [#tpu.dimension_semantics<parallel>], iteration_bounds = array<i64: 1>, scalar_prefetch = 0 : i64, scratch_operands = 0 : i64, tpu.core_type = #tpu.core_type<tc>, window_params = [{transform_indices = @transform_0, window_bounds = array<i64: 8, 32>}, {pipeline_mode = #tpu.pipeline_mode<synchronous>, transform_indices = @transform_1, window_bounds = array<i64: 32, 32>}, {pipeline_mode = #tpu.pipeline_mode<synchronous>, transform_indices = @transform_2, window_bounds = array<i64: 1, 32>}, {pipeline_mode = #tpu.pipeline_mode<synchronous>, transform_indices = @transform_3, window_bounds = array<i64: 32, 32>}, {pipeline_mode = #tpu.pipeline_mode<synchronous>, transform_indices = @transform_4, window_bounds = array<i64: 32, 16>}, {transform_indices = @transform_5, window_bounds = array<i64: 8, 16>}]} {
    %c0 = arith.constant 0 : index
    %c0_0 = arith.constant 0 : index
    %0 = vector.load %arg1[%c0, %c0_0] : memref<8x32xf32, #tpu.memory_space<vmem>>, vector<8x32xf32>
    %c0_1 = arith.constant 0 : index
    %c0_2 = arith.constant 0 : index
    %1 = vector.load %arg2[%c0_1, %c0_2] : memref<32x32xf32, #tpu.memory_space<vmem>>, vector<32x32xf32>
    %cst = arith.constant dense<0.000000e+00> : vector<8x32xf32>
    %2 = tpu.matmul %0, %1, %cst {dimension_numbers = #tpu.dot_dimension_numbers<[1], [0], [0], [1], [0, 0, 1, 1], [], []>} : vector<8x32xf32>, vector<32x32xf32>, vector<8x32xf32> -> vector<8x32xf32>
    %c0_3 = arith.constant 0 : index
    %c0_4 = arith.constant 0 : index
    %3 = vector.load %arg3[%c0_3, %c0_4] : memref<1x32xf32, #tpu.memory_space<vmem>>, vector<1x32xf32>
    %4 = vector.broadcast %3 : vector<1x32xf32> to vector<8x32xf32>
    %5 = arith.addf %2, %4 : vector<8x32xf32>
    %cst_5 = arith.constant 0.000000e+00 : f32
    %6 = vector.broadcast %cst_5 : f32 to vector<8x32xf32>
    %7 = arith.maximumf %5, %6 : vector<8x32xf32>
    %c0_6 = arith.constant 0 : index
    %c0_7 = arith.constant 0 : index
    %8 = vector.load %arg4[%c0_6, %c0_7] : memref<32x32xf32, #tpu.memory_space<vmem>>, vector<32x32xf32>
    %cst_8 = arith.constant dense<0.000000e+00> : vector<8x32xf32>
    %9 = tpu.matmul %7, %8, %cst_8 {dimension_numbers = #tpu.dot_dimension_numbers<[1], [0], [0], [1], [0, 0, 1, 1], [], []>} : vector<8x32xf32>, vector<32x32xf32>, vector<8x32xf32> -> vector<8x32xf32>
    %cst_9 = arith.constant 0.000000e+00 : f32
    %10 = vector.broadcast %cst_9 : f32 to vector<8x32xf32>
    %11 = arith.maximumf %9, %10 : vector<8x32xf32>
    %c0_10 = arith.constant 0 : index
    %c0_11 = arith.constant 0 : index
    %12 = vector.load %arg5[%c0_10, %c0_11] : memref<32x16xf32, #tpu.memory_space<vmem>>, vector<32x16xf32>
    %cst_12 = arith.constant dense<0.000000e+00> : vector<8x16xf32>
    %13 = tpu.matmul %11, %12, %cst_12 {dimension_numbers = #tpu.dot_dimension_numbers<[1], [0], [0], [1], [0, 0, 1, 1], [], []>} : vector<8x32xf32>, vector<32x16xf32>, vector<8x16xf32> -> vector<8x16xf32>
    %c0_13 = arith.constant 0 : index
    %c0_14 = arith.constant 0 : index
    %14 = vector.load %arg6[%c0_13, %c0_14] : memref<8x16xf32, #tpu.memory_space<vmem>>, vector<8x16xf32>
    tpu.vector_store %arg6[%c0_13, %c0_14], %13 {strides = array<i32>} : memref<8x16xf32, #tpu.memory_space<vmem>>, vector<8x16xf32>,
    return
  }
  func.func @transform_0(%arg0: i32) -> (i32, i32) {
    %c0_i32 = arith.constant 0 : i32
    %c0_i32_0 = arith.constant 0 : i32
    return %arg0, %c0_i32 : i32, i32
  }
  func.func @transform_1(%arg0: i32) -> (i32, i32) {
    %c0_i32 = arith.constant 0 : i32
    %c0_i32_0 = arith.constant 0 : i32
    %c0_i32_1 = arith.constant 0 : i32
    return %c0_i32, %c0_i32_0 : i32, i32
  }
  func.func @transform_2(%arg0: i32) -> (i32, i32) {
    %c0_i32 = arith.constant 0 : i32
    %c0_i32_0 = arith.constant 0 : i32
    %c0_i32_1 = arith.constant 0 : i32
    return %c0_i32, %c0_i32_0 : i32, i32
  }
  func.func @transform_3(%arg0: i32) -> (i32, i32) {
    %c0_i32 = arith.constant 0 : i32
    %c0_i32_0 = arith.constant 0 : i32
    %c0_i32_1 = arith.constant 0 : i32
    return %c0_i32, %c0_i32_0 : i32, i32
  }
  func.func @transform_4(%arg0: i32) -> (i32, i32) {
    %c0_i32 = arith.constant 0 : i32
    %c0_i32_0 = arith.constant 0 : i32
    %c0_i32_1 = arith.constant 0 : i32
    return %c0_i32, %c0_i32_0 : i32, i32
  }
  func.func @transform_5(%arg0: i32) -> (i32, i32) {
    %c0_i32 = arith.constant 0 : i32
    %c0_i32_0 = arith.constant 0 : i32
    return %arg0, %c0_i32 : i32, i32
  }
}

</mosaic_0001>

<bundles_post_ra>
// kernel: encoding_model_forward.1
= control target key start
LH: loop header
LB: loop body
LE: loop exit
PB: predicated region body
PF: predicated region fallthrough
CT: control target
= control target key end

     0   :  { %10 = vsyncpa [#allocation3], 0  ;;  %s516_s0 = inlined_call_operand.vmem [shape: f32[8,32], index: 0, kind: input, shape index: {}]   ;;  %s517_s1 = inlined_call_operand.vmem [shape: f32[32,32], index: 1, kind: input, shape index: {}]   ;;  %s518_s2 = inlined_call_operand.vmem [shape: f32[1,32], index: 2, kind: input, shape index: {}]   ;;  %s519_s3 = inlined_call_operand.hbm [shape: f32[32,32], index: 3, kind: input, shape index: {}]   ;;  %s520_s4 = inlined_call_operand.vmem [shape: f32[32,16], index: 4, kind: input, shape index: {}]   ;;  %s521_s5 = inlined_call_operand.hbm [shape: f32[8,16], index: 5, kind: output, shape index: {}]  }
   0x1   :  { %11 = vsyncpa [#allocation4], 0  ;;  %s419_s18 = smov [#allocation2]   ;;  %s371_s22 = scalar_lea.hbm %s519_s3, 512 }
   0x2   :  { %s23_s19 = sshll.u32 %s419_s18, 4  ;;  %p372_p0 = scmp.ne.s32.totalorder %s519_s3, %s371_s22  ;;  %s24_s19 = int_to_ptr.vmem [resolvable:$true] %s23_s19 }
   0x3   :  { %p375_p1 = scmp.lt.u32.totalorder %s371_s22, %s519_s3 }
   0x5   :  { %p377_p2 = pnand %p375_p1, %p372_p0 }
   0x7   :  { %380 = shalt.err (!%p377_p2)
}
   0x8   :  { %s381_s27 = scalar_lea.vmem %s24_s19, 512  ;;  %p386_p4 = scmp.lt.s32.totalorder %s24_s19, %s24_s19 }
   0x9   :  { %p382_p3 = scmp.ne.s32.totalorder %s24_s19, %s381_s27  ;;  %p387_p5 = scmp.lt.s32.totalorder %s381_s27, %s381_s27 }
   0xb   :  { %p388_p6 = por %p387_p5, %p386_p4 }
   0xd   :  { %p389_p7 = pnand %p388_p6, %p382_p3 }
   0xf   :  { %392 = shalt.err (!%p389_p7)
}
  0x10   :  { %s420_s28 = smov 128   ;;  %s421_s29 = smov 8  }
  0x11   :  { %29 = dma.hbm_to_vmem [thread:$0]  %s519_s3, 512, %s24_s19, [#allocation3], %s420_s28, %s420_s28, %s421_s29  }
  0x12   :  { %415 = dma.done.wait [#allocation3], 512  }
  0x13   :  { %416 = vsyncadd [#allocation3], 4294966784  ;;  %v422_v0 = vmov 0.0|0.0   ;;  %vm423_vm0 = vmmov 0   ;;  %v424_v1 = vmov 0.0   ;;  %v36_v2 = vld [vmem:[%s517_s1] sm:$0xff] }
  0x14   :  { %346 = vmatprep.subr.bf16.mxu0 %v422_v0  ;;  %321 = vmatprep.mubr.msk.f32.mxu0 %vm423_vm0, %v424_v1  ;;  %v37_v3 = vld [vmem:[%s517_s1 + $0x8] sm:$0xff]  ;;  %v38_v4 = vld [vmem:[%s517_s1 + $0x10] sm:$0xff]  ;;  %v39_v6 = vld [vmem:[%s517_s1 + $0x18] sm:$0xff]  ;;  %vm47_vm1 = vcmask 261120   ;;  %vm277_vm2 = vcmask 130048  }
  0x15   :  { %352 = vmatprep.subr.bf16.mxu1 %v422_v0  ;;  %332 = vmatprep.mubr.msk.f32.mxu1 %vm423_vm0, %v424_v1  ;;  %v347_v5 = vpack.c.bf16 %v37_v3, %v36_v2  ;;  %v122_v7 = vld [vmem:[#allocation2] sm:$0xff]  ;;  %v123_v8 = vld [vmem:[#allocation2 + $0x8] sm:$0xff]  ;;  %v350_v9 = vpack.c.bf16 %v39_v6, %v38_v4  ;;  %v124_v12 = vld [vmem:[#allocation2 + $0x10] sm:$0xff] }
  0x16   :  { %v353_v10 = vpack.c.bf16 %v123_v8, %v122_v7  ;;  %v35_v11 = vld [vmem:[%s516_s0] sm:$0xff]  ;;  %v125_v13 = vld [vmem:[#allocation2 + $0x18] sm:$0xff]  ;;  %v201_v16 = vld [vmem:[%s520_s4 + $0x8] sm:$0xff] }
  0x17   :  { %348 = vmatpush3.bf16.msra.mxu0 %v347_v5  ;;  %v356_v14 = vpack.c.bf16 %v125_v13, %v124_v12  ;;  %v200_v15 = vld [vmem:[%s520_s4] sm:$0xff]  ;;  %v202_v23 = vld [vmem:[%s520_s4 + $0x10] sm:$0xff]  ;;  %v203_v24 = vld [vmem:[%s520_s4 + $0x18] sm:$0xff] }
  0x18   :  { %349 = vmatprep.subr.bf16.mxu0 %v422_v0  ;;  %354 = vmatpush3.bf16.msra.mxu1 %v353_v10  ;;  %v359_v17 = vpack.c.bf16 %v201_v16, %v200_v15  ;;  %v294_v18 = vld [vmem:[%s518_s2] ss:$0 sm:$0xff]  ;;  %v362_v25 = vpack.c.bf16 %v203_v24, %v202_v23  ;;  %s425_s2 = smov [#allocation5]  }
  0x19   :  { %355 = vmatprep.subr.bf16.mxu1 %v422_v0  ;;  %s285_s24 = sshll.u32 %s425_s2, 4  ;;  %s286_s24 = int_to_ptr.vmem [resolvable:$true] %s285_s24 }
  0x1a   :  { %s393_s25 = scalar_lea.vmem %s286_s24, 128  ;;  %p398_p9 = scmp.lt.s32.totalorder %s286_s24, %s286_s24 }
  0x1b   :  { %351 = vmatpush3.bf16.msra.mxu0 %v350_v9  ;;  %p394_p8 = scmp.ne.s32.totalorder %s286_s24, %s393_s25  ;;  %p399_p10 = scmp.lt.s32.totalorder %s393_s25, %s393_s25 }
  0x1c   :  { %358 = vmatprep.subr.bf16.mxu0 %v422_v0  ;;  %357 = vmatpush3.bf16.msra.mxu1 %v356_v14 }
  0x1d   :  { %p400_p11 = por %p399_p10, %p398_p9 }
  0x1e   :  { %322 = vmatmul.mubr.msk.f32.vlgmr.msra.gmra.mrb[0].mxu0 %vm47_vm1, %v35_v11 }
  0x1f   :  { %343 = vmatprep.mubr.msk.f32.mxu0 %vm423_vm0, %v424_v1  ;;  %360 = vmatpush3.bf16.msra.mxu0 %v359_v17  ;;  %p401_p12 = pnand %p400_p11, %p394_p8 }
  0x20   :  { %361 = vmatprep.subr.bf16.mxu0 %v422_v0 }
  0x23   :  { %363 = vmatpush3.bf16.msra.mxu0 %v362_v25 }
  0xf1   :  { %v117_v19 = vpop.f32.mrb[0].mxu0 }
  0xf2   :  { %v118_v20 = vadd.f32 %v294_v18, %v117_v19  ;;  %v323_v21 = vpop.f32.mrb[1].mxu0 }
  0xf4   :  { %v121_v22 = vmax.f32 %v118_v20, 0.0 }
  0xf6   :  { %333 = vmatmul.mubr.msk.f32.vlgmr.msra.gmra.mrb[0].mxu1 %vm47_vm1, %v121_v22 }
 0x1c9   :  { %v195_v26 = vpop.f32.mrb[0].mxu1 }
 0x1ca   :  { %v199_v27 = vmax.f32 %v195_v26, 0.0  ;;  %v334_v28 = vpop.f32.mrb[1].mxu1 }
 0x1cc   :  { %344 = vmatmul.mubr.msk.f32.vlgmr.msra.gmra.mrb[2].mxu0 %vm47_vm1, %v199_v27 }
 0x29f   :  { %v273_v29 = vpop.f32.mrb[2].mxu0 }
 0x2a0   :  { %v345_v30 = vpop.f32.mrb[3].mxu0  ;;  %278 = vst.msk [vmem:[#allocation5] sm:$0xff] %vm277_vm2, %v273_v29 }
 0x2a1   :  { %404 = shalt.err (!%p401_p12)
}
 0x2a2   :  { %s405_s27 = scalar_lea.hbm %s521_s5, 128 }
 0x2a3   :  { %p406_p13 = scmp.ne.s32.totalorder %s521_s5, %s405_s27  ;;  %p409_p0 = scmp.lt.u32.totalorder %s405_s27, %s521_s5 }
 0x2a5   :  { %p411_p1 = pnand %p409_p0, %p406_p13 }
 0x2a7   :  { %414 = shalt.err (!%p411_p1)
}
 0x2a8   :  { %288 = dma.vmem_to_hbm [thread:$0]  %s286_s24, 128, %s521_s5, [#allocation4]  }
 0x2a9   :  { %417 = dma.done.wait [#allocation4], 128  }
 0x2aa   :  { %418 = vsyncadd [#allocation4], 4294967168 }
 0x2ab   :  { %292 = vsyncpa [#allocation3], 1 }
 0x2ac   :  { %293 = vsyncpa [#allocation4], 1 }

</bundles_post_ra>
